<compile_context>
chip_gen: v5e
topology: v5e:2x2
jax: 0.10.0
libtpu: 0.0.40
codegen_flags: <defaults>
</compile_context>

<pallas_src>
import functools

import jax
import jax.numpy as jnp
from jax.experimental import pallas as pl
from jax.experimental.pallas import tpu as pltpu

HIDDEN1, HIDDEN2, OUT_DIM = 64, 32, 4
_LANE = 128  # TPU lane width; batch tile must be a multiple of this (or equal full dim)


def _mlp_kernel(xT_ref, w1_ref, b1_ref, w2_ref, b2_ref, w3_ref, b3_ref, oT_ref):
    """Fused 3-layer MLP in transposed orientation (batch on lanes).

    xT_ref : (D, block_b)   bf16   -- one batch tile, batch is the lane axis
    w*_ref : (out, in)      bf16   -- PyTorch nn.Linear weight orientation
    b*_ref : (out, 1)       f32
    oT_ref : (4, block_b)   f32    -- lane-dense output tile
    """
    xT = xT_ref[...]
    # layer 1: (64, D) @ (D, B) -> (64, B), f32 accumulation on the MXU
    h1 = jnp.dot(w1_ref[...], xT, preferred_element_type=jnp.float32) + b1_ref[...]
    h1 = jnp.maximum(h1, 0.0).astype(jnp.bfloat16)
    # layer 2: (32, 64) @ (64, B) -> (32, B)
    h2 = jnp.dot(w2_ref[...], h1, preferred_element_type=jnp.float32) + b2_ref[...]
    h2 = jnp.maximum(h2, 0.0).astype(jnp.bfloat16)
    # layer 3: (4, 32) @ (32, B) -> (4, B)
    y = jnp.dot(w3_ref[...], h2, preferred_element_type=jnp.float32) + b3_ref[...]
    oT_ref[...] = y.astype(oT_ref.dtype)


def _pick_block_b(B, D):
    """Batch tile: multiple of 128 lanes, VMEM-budgeted (v7x-safe), capped at 2048.

    Double-buffered bf16 x tile is 2 * block_b * D * 2 bytes; keep it <= ~8 MiB so the
    whole kernel (inputs + intermediates + outputs) stays far below the 32 MiB scoped
    VMEM limit on every generation (incl. v7x's 64 MiB physical VMEM).
    """
    budget_bytes = 8 * 1024 * 1024
    cap = max(_LANE, (budget_bytes // (4 * max(D, 1))) // _LANE * _LANE)
    bb = min(2048, cap)
    b_pad_min = pl.cdiv(max(B, 1), _LANE) * _LANE
    return max(_LANE, min(bb, b_pad_min))


@functools.partial(jax.jit, static_argnames=("block_b",))
def self_interaction_forward(x, params, block_b=None):
    """x: (B, input_dim) float32. params in nn.Linear layout. Returns (B, 4) float32."""
    w1, b1, w2, b2, w3, b3 = params
    B, D = x.shape
    if block_b is None:
        block_b = _pick_block_b(B, D)
    assert block_b % _LANE == 0
    num_blocks = pl.cdiv(B, block_b)
    B_pad = num_blocks * block_b

    # Layout plumbing (single fused XLA pass over x; not compute):
    #  * pad batch to a multiple of block_b, put batch on the lane axis
    #  * cast x / weights to bf16 for the loads & MXU; biases stay f32
    xT = jnp.pad(x, ((0, B_pad - B), (0, 0))).T.astype(jnp.bfloat16)  # (D, B_pad)
    w1b = w1.astype(jnp.bfloat16)
    w2b = w2.astype(jnp.bfloat16)
    w3b = w3.astype(jnp.bfloat16)
    b1c = b1.reshape(HIDDEN1, 1).astype(jnp.float32)
    b2c = b2.reshape(HIDDEN2, 1).astype(jnp.float32)
    b3c = b3.reshape(OUT_DIM, 1).astype(jnp.float32)

    grid_spec = pl.GridSpec(
        grid=(num_blocks,),
        in_specs=[
            pl.BlockSpec((D, block_b), lambda i: (0, i)),   # x tile (batch on lanes)
            pl.BlockSpec(w1b.shape, lambda i: (0, 0)),      # weights / biases: constant
            pl.BlockSpec(b1c.shape, lambda i: (0, 0)),      # index_map -> stay resident
            pl.BlockSpec(w2b.shape, lambda i: (0, 0)),      # across all grid steps
            pl.BlockSpec(b2c.shape, lambda i: (0, 0)),
            pl.BlockSpec(w3b.shape, lambda i: (0, 0)),
            pl.BlockSpec(b3c.shape, lambda i: (0, 0)),
        ],
        out_specs=pl.BlockSpec((OUT_DIM, block_b), lambda i: (0, i)),  # lane-dense store
    )

    outT = pl.pallas_call(
        _mlp_kernel,
        out_shape=jax.ShapeDtypeStruct((OUT_DIM, B_pad), jnp.float32),
        grid_spec=grid_spec,
        compiler_params=pltpu.CompilerParams(
            dimension_semantics=("parallel",),      # batch axis shards across v7x's 2 TCs
            vmem_limit_bytes=32 * 1024 * 1024,
        ),
    )(xT, w1b, b1c, w2b, b2c, w3b, b3c)

    return outT[:, :B].T  # (B, 4)


def init_params(key, input_dim):
    """nn.Linear-style init: W (out, in), b (out,), uniform +/- 1/sqrt(fan_in)."""
    dims = [(input_dim, HIDDEN1), (HIDDEN1, HIDDEN2), (HIDDEN2, OUT_DIM)]
    params = []
    for fan_in, fan_out in dims:
        key, kw, kb = jax.random.split(key, 3)
        bound = 1.0 / jnp.sqrt(jnp.float32(fan_in))
        w = jax.random.uniform(kw, (fan_out, fan_in), jnp.float32, -bound, bound)
        b = jax.random.uniform(kb, (fan_out,), jnp.float32, -bound, bound)
        params.extend([w, b])
    return tuple(params)


def _reference_forward_f32(x, params):
    """Exact PyTorch-module semantics in f32."""
    w1, b1, w2, b2, w3, b3 = params
    h1 = jnp.maximum(x @ w1.T + b1, 0.0)
    h2 = jnp.maximum(h1 @ w2.T + b2, 0.0)
    return h2 @ w3.T + b3


def _reference_forward_bf16(x, params):
    """Same math the kernel does: bf16 inputs/weights/activations, f32 accumulation."""
    w1, b1, w2, b2, w3, b3 = params
    f32 = jnp.float32
    xb = x.astype(jnp.bfloat16).astype(f32)
    w1b, w2b, w3b = (w.astype(jnp.bfloat16).astype(f32) for w in (w1, w2, w3))
    h1 = jnp.maximum(xb @ w1b.T + b1, 0.0).astype(jnp.bfloat16).astype(f32)
    h2 = jnp.maximum(h1 @ w2b.T + b2, 0.0).astype(jnp.bfloat16).astype(f32)
    return h2 @ w3b.T + b3


if __name__ == "__main__":
    key = jax.random.PRNGKey(0)
    key, kx = jax.random.split(key)

    batch, input_dim = 8, 32
    x = jax.random.normal(kx, (batch, input_dim), jnp.float32)
    params = init_params(key, input_dim)

    out = self_interaction_forward(x, params)
    out = jax.block_until_ready(out)
    assert out.shape == (batch, OUT_DIM)

    # Strict check against a reference doing the same bf16-load / f32-accumulate math.
    ref_bf16 = _reference_forward_bf16(x, params)
    assert jnp.allclose(out, ref_bf16, atol=1e-4, rtol=1e-4), "mismatch vs bf16 reference"

    # Loose check against the pure-f32 PyTorch-module semantics (bf16 rounding tolerance).
    ref_f32 = _reference_forward_f32(x, params)
    assert jnp.allclose(out, ref_f32, atol=5e-2, rtol=5e-2), "mismatch vs f32 reference"

    print("KERNEL_OK")
</pallas_src>

<mosaic_0001>
module attributes {stable_mosaic.version = 11 : i64} {
  func.func @_mlp_kernel(%arg0: i32, %arg1: memref<32x128xbf16, #tpu.memory_space<vmem>>, %arg2: memref<64x32xbf16, #tpu.memory_space<vmem>>, %arg3: memref<64x1xf32, #tpu.memory_space<vmem>>, %arg4: memref<32x64xbf16, #tpu.memory_space<vmem>>, %arg5: memref<32x1xf32, #tpu.memory_space<vmem>>, %arg6: memref<4x32xbf16, #tpu.memory_space<vmem>>, %arg7: memref<4x1xf32, #tpu.memory_space<vmem>>, %arg8: memref<4x128xf32, #tpu.memory_space<vmem>>) attributes {dimension_semantics = [#tpu.dimension_semantics<parallel>], iteration_bounds = array<i64: 1>, scalar_prefetch = 0 : i64, scratch_operands = 0 : i64, tpu.core_type = #tpu.core_type<tc>, window_params = [{transform_indices = @transform_0, window_bounds = array<i64: 32, 128>}, {pipeline_mode = #tpu.pipeline_mode<synchronous>, transform_indices = @transform_1, window_bounds = array<i64: 64, 32>}, {pipeline_mode = #tpu.pipeline_mode<synchronous>, transform_indices = @transform_2, window_bounds = array<i64: 64, 1>}, {pipeline_mode = #tpu.pipeline_mode<synchronous>, transform_indices = @transform_3, window_bounds = array<i64: 32, 64>}, {pipeline_mode = #tpu.pipeline_mode<synchronous>, transform_indices = @transform_4, window_bounds = array<i64: 32, 1>}, {pipeline_mode = #tpu.pipeline_mode<synchronous>, transform_indices = @transform_5, window_bounds = array<i64: 4, 32>}, {pipeline_mode = #tpu.pipeline_mode<synchronous>, transform_indices = @transform_6, window_bounds = array<i64: 4, 1>}, {transform_indices = @transform_7, window_bounds = array<i64: 4, 128>}]} {
    %c0 = arith.constant 0 : index
    %c0_0 = arith.constant 0 : index
    %0 = vector.load %arg1[%c0, %c0_0] : memref<32x128xbf16, #tpu.memory_space<vmem>>, vector<32x128xbf16>
    %c0_1 = arith.constant 0 : index
    %c0_2 = arith.constant 0 : index
    %1 = vector.load %arg2[%c0_1, %c0_2] : memref<64x32xbf16, #tpu.memory_space<vmem>>, vector<64x32xbf16>
    %cst = arith.constant dense<0.000000e+00> : vector<64x128xf32>
    %2 = tpu.matmul %1, %0, %cst {dimension_numbers = #tpu.dot_dimension_numbers<[1], [0], [0], [1], [0, 0, 1, 1], [], []>} : vector<64x32xbf16>, vector<32x128xbf16>, vector<64x128xf32> -> vector<64x128xf32>
    %c0_3 = arith.constant 0 : index
    %c0_4 = arith.constant 0 : index
    %3 = vector.load %arg3[%c0_3, %c0_4] : memref<64x1xf32, #tpu.memory_space<vmem>>, vector<64x1xf32>
    %4 = vector.broadcast %3 : vector<64x1xf32> to vector<64x128xf32>
    %5 = arith.addf %2, %4 : vector<64x128xf32>
    %cst_5 = arith.constant 0.000000e+00 : f32
    %6 = vector.broadcast %cst_5 : f32 to vector<64x128xf32>
    %7 = arith.maximumf %5, %6 : vector<64x128xf32>
    %8 = arith.truncf %7 : vector<64x128xf32> to vector<64x128xbf16>
    %c0_6 = arith.constant 0 : index
    %c0_7 = arith.constant 0 : index
    %9 = vector.load %arg4[%c0_6, %c0_7] : memref<32x64xbf16, #tpu.memory_space<vmem>>, vector<32x64xbf16>
    %cst_8 = arith.constant dense<0.000000e+00> : vector<32x128xf32>
    %10 = tpu.matmul %9, %8, %cst_8 {dimension_numbers = #tpu.dot_dimension_numbers<[1], [0], [0], [1], [0, 0, 1, 1], [], []>} : vector<32x64xbf16>, vector<64x128xbf16>, vector<32x128xf32> -> vector<32x128xf32>
    %c0_9 = arith.constant 0 : index
    %c0_10 = arith.constant 0 : index
    %11 = vector.load %arg5[%c0_9, %c0_10] : memref<32x1xf32, #tpu.memory_space<vmem>>, vector<32x1xf32>
    %12 = vector.broadcast %11 : vector<32x1xf32> to vector<32x128xf32>
    %13 = arith.addf %10, %12 : vector<32x128xf32>
    %cst_11 = arith.constant 0.000000e+00 : f32
    %14 = vector.broadcast %cst_11 : f32 to vector<32x128xf32>
    %15 = arith.maximumf %13, %14 : vector<32x128xf32>
    %16 = arith.truncf %15 : vector<32x128xf32> to vector<32x128xbf16>
    %c0_12 = arith.constant 0 : index
    %c0_13 = arith.constant 0 : index
    %17 = vector.load %arg6[%c0_12, %c0_13] : memref<4x32xbf16, #tpu.memory_space<vmem>>, vector<4x32xbf16>
    %cst_14 = arith.constant dense<0.000000e+00> : vector<4x128xf32>
    %18 = tpu.matmul %17, %16, %cst_14 {dimension_numbers = #tpu.dot_dimension_numbers<[1], [0], [0], [1], [0, 0, 1, 1], [], []>} : vector<4x32xbf16>, vector<32x128xbf16>, vector<4x128xf32> -> vector<4x128xf32>
    %c0_15 = arith.constant 0 : index
    %c0_16 = arith.constant 0 : index
    %19 = vector.load %arg7[%c0_15, %c0_16] : memref<4x1xf32, #tpu.memory_space<vmem>>, vector<4x1xf32>
    %20 = vector.broadcast %19 : vector<4x1xf32> to vector<4x128xf32>
    %21 = arith.addf %18, %20 : vector<4x128xf32>
    %c0_17 = arith.constant 0 : index
    %c0_18 = arith.constant 0 : index
    %22 = vector.load %arg8[%c0_17, %c0_18] : memref<4x128xf32, #tpu.memory_space<vmem>>, vector<4x128xf32>
    tpu.vector_store %arg8[%c0_17, %c0_18], %21 {strides = array<i32>} : memref<4x128xf32, #tpu.memory_space<vmem>>, vector<4x128xf32>,
    return
  }
  func.func @transform_0(%arg0: i32) -> (i32, i32) {
    %c0_i32 = arith.constant 0 : i32
    %c0_i32_0 = arith.constant 0 : i32
    return %c0_i32, %arg0 : i32, i32
  }
  func.func @transform_1(%arg0: i32) -> (i32, i32) {
    %c0_i32 = arith.constant 0 : i32
    %c0_i32_0 = arith.constant 0 : i32
    %c0_i32_1 = arith.constant 0 : i32
    return %c0_i32, %c0_i32_0 : i32, i32
  }
  func.func @transform_2(%arg0: i32) -> (i32, i32) {
    %c0_i32 = arith.constant 0 : i32
    %c0_i32_0 = arith.constant 0 : i32
    %c0_i32_1 = arith.constant 0 : i32
    return %c0_i32, %c0_i32_0 : i32, i32
  }
  func.func @transform_3(%arg0: i32) -> (i32, i32) {
    %c0_i32 = arith.constant 0 : i32
    %c0_i32_0 = arith.constant 0 : i32
    %c0_i32_1 = arith.constant 0 : i32
    return %c0_i32, %c0_i32_0 : i32, i32
  }
  func.func @transform_4(%arg0: i32) -> (i32, i32) {
    %c0_i32 = arith.constant 0 : i32
    %c0_i32_0 = arith.constant 0 : i32
    %c0_i32_1 = arith.constant 0 : i32
    return %c0_i32, %c0_i32_0 : i32, i32
  }
  func.func @transform_5(%arg0: i32) -> (i32, i32) {
    %c0_i32 = arith.constant 0 : i32
    %c0_i32_0 = arith.constant 0 : i32
    %c0_i32_1 = arith.constant 0 : i32
    return %c0_i32, %c0_i32_0 : i32, i32
  }
  func.func @transform_6(%arg0: i32) -> (i32, i32) {
    %c0_i32 = arith.constant 0 : i32
    %c0_i32_0 = arith.constant 0 : i32
    %c0_i32_1 = arith.constant 0 : i32
    return %c0_i32, %c0_i32_0 : i32, i32
  }
  func.func @transform_7(%arg0: i32) -> (i32, i32) {
    %c0_i32 = arith.constant 0 : i32
    %c0_i32_0 = arith.constant 0 : i32
    return %c0_i32, %arg0 : i32, i32
  }
}

</mosaic_0001>

<bundles_post_ra>
// kernel: self_interaction_forward.1
= control target key start
LH: loop header
LB: loop body
LE: loop exit
PB: predicated region body
PF: predicated region fallthrough
CT: control target
= control target key end

     0   :  { %v324_v1 = vmov 0   ;;  %vm119_vm0 = vcmask 261120   ;;  %vm211_vm1 = vcmask 523264   ;;  %s439_s0 = inlined_call_operand.vmem [shape: bf16[32,128], index: 0, kind: input, shape index: {}]   ;;  %s440_s2 = inlined_call_operand.vmem [shape: f32[64,1], index: 2, kind: input, shape index: {}]   ;;  %s441_s1 = inlined_call_operand.vmem [shape: bf16[64,32], index: 1, kind: input, shape index: {}]   ;;  %s442_s4 = inlined_call_operand.vmem [shape: f32[32,1], index: 4, kind: input, shape index: {}]   ;;  %s443_s6 = inlined_call_operand.vmem [shape: f32[4,1], index: 6, kind: input, shape index: {}]   ;;  %s444_s3 = inlined_call_operand.vmem [shape: bf16[32,64], index: 3, kind: input, shape index: {}]   ;;  %s445_s5 = inlined_call_operand.vmem [shape: bf16[4,32], index: 5, kind: input, shape index: {}]   ;;  %s446_s7 = inlined_call_operand.vmem [shape: f32[4,128], index: 7, kind: output, shape index: {}]  }
   0x1   :  { %v311_v0 = vld [vmem:[%s439_s0 + $0x8] sm:$0xff]  ;;  %321 = vset.pattern.permute.xlu0 %v324_v1  ;;  %322 = vset.pattern.permute.xlu1 %v324_v1  ;;  %v45_v2 = vld [vmem:[%s440_s2 + $0x30] sm:$0xff]  ;;  %v310_v3 = vld [vmem:[%s439_s0] sm:$0xff] }
   0x2   :  { %323 = vset.pattern.permute.xlu2 %v324_v1  ;;  %318 = vmatpush.bf16.msra.mxu3 %v311_v0  ;;  %v43_v4 = vld [vmem:[%s440_s2 + $0x20] sm:$0xff]  ;;  %v314_v5 = vld [vmem:[%s441_s1 + $0x10] sm:$0xff]  ;;  %v46_v8 = vld [vmem:[%s440_s2 + $0x38] sm:$0xff] }
   0x3   :  { %138 = vmatpush.bf16.msra.mxu0 %v311_v0  ;;  %79 = vperm.xlu0 %321, %v45_v2   ;;  %v312_v6 = vld [vmem:[%s441_s1] sm:$0xff]  ;;  %v41_v7 = vld [vmem:[%s440_s2 + $0x10] sm:$0xff]  ;;  %v44_v9 = vld [vmem:[%s440_s2 + $0x28] sm:$0xff] }
   0x4   :  { %69 = vperm.xlu1 %322, %v43_v4   ;;  %59 = vperm.xlu2 %323, %v41_v7   ;;  %v42_v10 = vld [vmem:[%s440_s2 + $0x18] sm:$0xff]  ;;  %v39_v11 = vld [vmem:[%s440_s2] sm:$0xff]  ;;  %v40_v12 = vld [vmem:[%s440_s2 + $0x8] sm:$0xff] }
   0x5   :  { %v179_v13 = vld [vmem:[%s442_s4 + $0x10] sm:$0xff]  ;;  %v315_v14 = vld [vmem:[%s441_s1 + $0x18] sm:$0xff]  ;;  %v313_v15 = vld [vmem:[%s441_s1 + $0x8] sm:$0xff] }
   0x6   :  { %319 = vmatpush.bf16.msra.mxu3 %v310_v3  ;;  %v180_v16 = vld [vmem:[%s442_s4 + $0x18] sm:$0xff]  ;;  %v177_v17 = vld [vmem:[%s442_s4] sm:$0xff]  ;;  %v178_v18 = vld [vmem:[%s442_s4 + $0x8] sm:$0xff] }
   0x7   :  { %139 = vmatpush.bf16.msra.mxu0 %v310_v3  ;;  %v244_v19 = vld [vmem:[%s443_s6] sm:$0xf]  ;;  %v317_v57 = vld [vmem:[%s444_s3 + $0x8] sm:$0xff] }
   0x8   :  { %v316_v56 = vld [vmem:[%s444_s3] sm:$0xff] }
   0x9   :  { %297 = vmatmul.msk.bf16.vlgmr.msra.gmra.mxu3 %vm119_vm0, %v314_v5 }
   0xa   :  { %295 = vmatmul.msk.bf16.vlgmr.msra.gmra.mxu0 %vm119_vm0, %v312_v6 }
   0xb   :  { %84 = vperm.xlu0 %321, %v46_v8  }
   0xc   :  { %74 = vperm.xlu1 %322, %v44_v9   ;;  %64 = vperm.xlu2 %323, %v42_v10  }
  0x13   :  { %49 = vperm.xlu0 %321, %v39_v11  }
  0x14   :  { %54 = vperm.xlu1 %322, %v40_v12   ;;  %193 = vperm.xlu2 %323, %v179_v13   ;;  %v243_v12 = vld [vmem:[%s445_s5] sm:$0x3] }
  0x19   :  { %298 = vmatmul.msk.bf16.gmra.mxu3 %vm119_vm0, %v315_v14 }
  0x1a   :  { %296 = vmatmul.msk.bf16.gmra.mxu0 %vm119_vm0, %v313_v15 }
  0x1b   :  { %198 = vperm.xlu0 %321, %v180_v16  }
  0x1c   :  { %183 = vperm.xlu1 %322, %v177_v17   ;;  %188 = vperm.xlu2 %323, %v178_v18  }
  0x23   :  { %247 = vperm.xlu0 %321, %v244_v19  }
  0x5e   :  { %v60_v28 = vpop.permute.xlu2 %59 }
  0x66   :  { %v65_v39 = vpop.permute.xlu2 %64 }
  0x6e   :  { %v194_v60 = vpop.permute.xlu2 %193 }
  0x75   :  { %v80_v25 = vpop.permute.xlu0 %79 }
  0x76   :  { %v70_v24 = vpop.permute.xlu1 %69  ;;  %v189_v62 = vpop.permute.xlu2 %188 }
  0x7d   :  { %v85_v30 = vpop.permute.xlu0 %84 }
  0x7e   :  { %v75_v29 = vpop.permute.xlu1 %74 }
  0x85   :  { %v50_v45 = vpop.permute.xlu0 %49 }
  0x86   :  { %v55_v44 = vpop.permute.xlu1 %54 }
  0x87   :  { %v141_v20 = vpop.f32.mrf.mxu0 }
  0x88   :  { %v142_v47 = vadd.f32 %v141_v20, %v50_v45 }
  0x8a   :  { %v161_v52 = vmax.f32 %v142_v47, 0.0 }
  0x8c   :  { %v151_v21 = vpop.f32.mrf.mxu3 }
  0x8d   :  { %v152_v36 = vadd.f32 %v151_v21, %v70_v24  ;;  %v199_v0 = vpop.permute.xlu0 %198 }
  0x8e   :  { %v184_v4 = vpop.permute.xlu1 %183 }
  0x8f   :  { %v143_v22 = vpop.f32.mrf.mxu0  ;;  %v165_v46 = vmax.f32 %v152_v36, 0.0 }
  0x90   :  { %v144_v48 = vadd.f32 %v143_v22, %v55_v44 }
  0x92   :  { %v162_v53 = vmax.f32 %v144_v48, 0.0 }
  0x94   :  { %v153_v23 = vpop.f32.mrf.mxu3  ;;  %v169_v55 = vpack.c.bf16 %v162_v53, %v161_v52 }
  0x95   :  { %v154_v33 = vadd.f32 %v153_v23, %v75_v29  ;;  %v248_v13 = vpop.permute.xlu0 %247 }
  0x97   :  { %v146_v26 = vpop.f32.mrf.mxu0  ;;  %v166_v40 = vmax.f32 %v154_v33, 0.0 }
  0x98   :  { %v147_v41 = vadd.f32 %v146_v26, %v60_v28 }
  0x99   :  { %v171_v51 = vpack.c.bf16 %v166_v40, %v165_v46 }
  0x9a   :  { %v163_v49 = vmax.f32 %v147_v41, 0.0 }
  0x9c   :  { %v156_v27 = vpop.f32.mrf.mxu3 }
  0x9d   :  { %v157_v31 = vadd.f32 %v156_v27, %v80_v25 }
  0x9f   :  { %v148_v35 = vpop.f32.mrf.mxu0  ;;  %v167_v37 = vmax.f32 %v157_v31, 0.0 }
  0xa0   :  { %v149_v42 = vadd.f32 %v148_v35, %v65_v39 }
  0xa2   :  { %v164_v50 = vmax.f32 %v149_v42, 0.0 }
  0xa4   :  { %v158_v32 = vpop.f32.mrf.mxu3  ;;  %v170_v54 = vpack.c.bf16 %v164_v50, %v163_v49 }
  0xa5   :  { %v159_v34 = vadd.f32 %v158_v32, %v85_v30 }
  0xa7   :  { %v168_v38 = vmax.f32 %v159_v34, 0.0 }
  0xa9   :  { %v172_v43 = vpack.c.bf16 %v168_v38, %v167_v37 }
  0xab   :  { %222 = vmatpush.bf16.msra.mxu1 %v172_v43 }
  0xaf   :  { %223 = vmatpush.bf16.msra.mxu1 %v171_v51 }
  0xb3   :  { %224 = vmatpush.bf16.msra.mxu1 %v170_v54 }
  0xb7   :  { %225 = vmatpush.bf16.msra.mxu1 %v169_v55 }
  0xba   :  { %307 = vmatmul.msk.bf16.vlgmr.msra.gmra.mxu1 %vm211_vm1, %v316_v56 }
  0xca   :  { %308 = vmatmul.msk.bf16.gmra.mxu1 %vm211_vm1, %v317_v57 }
 0x137   :  { %v227_v58 = vpop.f32.mrf.mxu1 }
 0x138   :  { %v228_v5 = vadd.f32 %v227_v58, %v184_v4 }
 0x13a   :  { %v237_v10 = vmax.f32 %v228_v5, 0.0 }
 0x13f   :  { %v229_v59 = vpop.f32.mrf.mxu1 }
 0x140   :  { %v230_v2 = vadd.f32 %v229_v59, %v189_v62 }
 0x142   :  { %v238_v8 = vmax.f32 %v230_v2, 0.0 }
 0x144   :  { %v241_v11 = vpack.c.bf16 %v238_v8, %v237_v10 }
 0x147   :  { %v232_v61 = vpop.f32.mrf.mxu1 }
 0x148   :  { %v233_v63 = vadd.f32 %v232_v61, %v194_v60 }
 0x14a   :  { %v239_v6 = vmax.f32 %v233_v63, 0.0 }
 0x14f   :  { %v234_v1 = vpop.f32.mrf.mxu1 }
 0x150   :  { %v235_v3 = vadd.f32 %v234_v1, %v199_v0 }
 0x152   :  { %v240_v7 = vmax.f32 %v235_v3, 0.0 }
 0x154   :  { %v242_v9 = vpack.c.bf16 %v240_v7, %v239_v6 }
 0x156   :  { %259 = vmatpush.bf16.msra.mxu2 %v242_v9 }
 0x15a   :  { %260 = vmatpush.bf16.msra.mxu2 %v241_v11 }
 0x15d   :  { %309 = vmatmul.msk.bf16.vlgmr.msra.gmra.mxu2 %vm119_vm0, %v243_v12 }
 0x1e0   :  { %v262_v14 = vpop.f32.mrf.mxu2 }
 0x1e1   :  { %v263_v15 = vadd.f32 %v262_v14, %v248_v13 }
 0x1e3   :  { %266 = vst [vmem:[%s446_s7] sm:$0xf] %v263_v15 }
 0x1e8   :  { %v264_v16 = vpop.f32.mrf.mxu2 }

</bundles_post_ra>
